<compile_context>
chip_gen: v7x
topology: tpu7x:2x2x1
jax: 0.10.0
libtpu: 0.0.40
codegen_flags: <defaults>
</compile_context>

<pallas_src>
import jax
import jax.numpy as jnp
from jax.experimental import pallas as pl
from jax.experimental.pallas import tpu as pltpu

LANES = 128


def _swish_kernel(beta_ref, x_ref, o_ref):
    # beta_ref: (1,) f32 scalar-prefetch ref in SMEM; x_ref/o_ref: VMEM tiles.
    beta = beta_ref[0]
    x = x_ref[...]
    # f32 math (no-op for f32 inputs; safe on v5e which lacks bf16 VPU/EUP).
    # TODO(synk): gate a native-bf16 path on chip version for v6e/v7x bf16 inputs.
    x32 = x.astype(jnp.float32)
    z = beta * x32
    # Single-EUP sigmoid (one tanh per element instead of exp + reciprocal).
    sig = 0.5 * jnp.tanh(0.5 * z) + 0.5
    o_ref[...] = (x32 * sig).astype(o_ref.dtype)


def _sublane_multiple(dtype) -> int:
    # f32 -> 8, bf16/f16 -> 16, int8/fp8 -> 32 (packed sublane tiles).
    itemsize = jnp.dtype(dtype).itemsize
    return {4: 8, 2: 16, 1: 32}.get(itemsize, 8)


def _round_up(v: int, m: int) -> int:
    return ((v + m - 1) // m) * m


def _default_block_bytes() -> int:
    # ~4 MiB amortizes the ~0.35 us/step pipeline overhead to ~5% on v5e/v6e.
    # v7x (3.2 TB/s HBM, 64 MiB VMEM) benefits from slightly larger blocks.
    try:
        info = pltpu.get_tpu_info()
        if getattr(info, "vmem_capacity_bytes", 128 << 20) <= (64 << 20):
            return 6 << 20  # v7x-class chip
    except Exception:
        pass
    return 4 << 20


def _swish_2d(x2d, beta_arr, *, target_block_bytes, vmem_limit_bytes):
    rows, cols = x2d.shape
    dtype = x2d.dtype
    itemsize = jnp.dtype(dtype).itemsize
    sublanes = _sublane_multiple(dtype)

    # VMEM footprint per block: lanes pad up to a multiple of 128.
    lane_cols = _round_up(cols, LANES)
    block_rows = max(sublanes, target_block_bytes // (lane_cols * itemsize))
    block_rows = (block_rows // sublanes) * sublanes

    # Prefer >= 2 grid blocks so "parallel" can shard across v7x's 2 TensorCores
    # (no-op on v5e/v6e which have a single TC per chip).
    half_rows = _round_up(-(-rows // 2), sublanes)
    br = max(sublanes, min(block_rows, half_rows))
    if br >= rows:
        br = rows  # single full-extent block for tiny inputs
    grid = (-(-rows // br),)  # ragged last block handled by Pallas (masked writes)

    return pl.pallas_call(
        _swish_kernel,
        out_shape=jax.ShapeDtypeStruct((rows, cols), dtype),
        grid_spec=pltpu.PrefetchScalarGridSpec(
            num_scalar_prefetch=1,  # beta -> SMEM, prefetched once before the grid
            grid=grid,
            in_specs=[pl.BlockSpec((br, cols), lambda i, beta: (i, 0))],
            out_specs=pl.BlockSpec((br, cols), lambda i, beta: (i, 0)),
        ),
        compiler_params=pltpu.CompilerParams(
            dimension_semantics=("parallel",),
            vmem_limit_bytes=vmem_limit_bytes,
        ),
    )(beta_arr, x2d)


def swish(x: jax.Array, beta, *, target_block_bytes: int | None = None,
          vmem_limit_bytes: int = 48 << 20) -> jax.Array:
    """Applies x * sigmoid(beta * x) elementwise. Works for any input shape."""
    orig_shape = x.shape
    n = x.size
    if n == 0:
        return x
    if target_block_bytes is None:
        target_block_bytes = _default_block_bytes()

    beta_arr = jnp.asarray(beta, dtype=jnp.float32).reshape((1,))

    if n % LANES == 0:
        # Zero-copy lane-dense path (common case for conv feature maps).
        x2d = x.reshape(n // LANES, LANES)
    elif x.ndim >= 2:
        # Ragged path: keep the native trailing dim (zero-copy, no pad/slice
        # HBM passes); less lane-dense if the last dim is small, but still a
        # single read + single write of the tensor.
        x2d = x.reshape(-1, orig_shape[-1])
    else:
        x2d = x.reshape(1, -1)

    out2d = _swish_2d(x2d, beta_arr,
                      target_block_bytes=target_block_bytes,
                      vmem_limit_bytes=vmem_limit_bytes)
    return out2d.reshape(orig_shape)


if __name__ == "__main__":
    key = jax.random.PRNGKey(0)

    # NCHW input, like the PyTorch module would see from a conv stack.
    x = jax.random.normal(key, (2, 4, 16, 16), dtype=jnp.float32)

    # Deterministic parameter init: beta = 1.0 (nn.Parameter(torch.tensor(1.0))).
    beta = jnp.float32(1.0)

    y = jax.block_until_ready(swish(x, beta))

    # Reference check in plain JAX.
    y_ref = x * jax.nn.sigmoid(beta * x)
    assert y.shape == x.shape and y.dtype == x.dtype
    assert jnp.max(jnp.abs(y - y_ref)) < 1e-4

    print("KERNEL_OK")
</pallas_src>

<mosaic_0001>
module attributes {stable_mosaic.version = 11 : i64} {
  func.func @_swish_kernel(%arg0: i32, %arg1: memref<1xf32, #tpu.memory_space<smem>>, %arg2: memref<8x128xf32, #tpu.memory_space<vmem>>, %arg3: memref<8x128xf32, #tpu.memory_space<vmem>>) attributes {dimension_semantics = [#tpu.dimension_semantics<parallel>], iteration_bounds = array<i64: 2>, scalar_prefetch = 1 : i64, scratch_operands = 0 : i64, tpu.core_type = #tpu.core_type<tc>, window_params = [{transform_indices = @transform_0, window_bounds = array<i64: 8, 128>}, {transform_indices = @transform_1, window_bounds = array<i64: 8, 128>}]} {
    %c0 = arith.constant 0 : index
    %0 = memref.load %arg1[%c0] : memref<1xf32, #tpu.memory_space<smem>>
    %c0_0 = arith.constant 0 : index
    %c0_1 = arith.constant 0 : index
    %1 = vector.load %arg2[%c0_0, %c0_1] : memref<8x128xf32, #tpu.memory_space<vmem>>, vector<8x128xf32>
    %2 = vector.broadcast %0 : f32 to vector<8x128xf32>
    %3 = arith.mulf %2, %1 : vector<8x128xf32>
    %cst = arith.constant 5.000000e-01 : f32
    %4 = vector.broadcast %cst : f32 to vector<8x128xf32>
    %5 = arith.mulf %4, %3 : vector<8x128xf32>
    %6 = math.tanh %5 : vector<8x128xf32>
    %cst_2 = arith.constant 5.000000e-01 : f32
    %7 = vector.broadcast %cst_2 : f32 to vector<8x128xf32>
    %8 = arith.mulf %7, %6 : vector<8x128xf32>
    %cst_3 = arith.constant 5.000000e-01 : f32
    %9 = vector.broadcast %cst_3 : f32 to vector<8x128xf32>
    %10 = arith.addf %8, %9 : vector<8x128xf32>
    %11 = arith.mulf %1, %10 : vector<8x128xf32>
    %c0_4 = arith.constant 0 : index
    %c0_5 = arith.constant 0 : index
    %12 = vector.load %arg3[%c0_4, %c0_5] : memref<8x128xf32, #tpu.memory_space<vmem>>, vector<8x128xf32>
    tpu.vector_store %arg3[%c0_4, %c0_5], %11 {strides = array<i32>} : memref<8x128xf32, #tpu.memory_space<vmem>>, vector<8x128xf32>,
    return
  }
  func.func @transform_0(%arg0: i32, %arg1: memref<1xf32, #tpu.memory_space<smem>>) -> (i32, i32) {
    %c0_i32 = arith.constant 0 : i32
    %c0_i32_0 = arith.constant 0 : i32
    return %arg0, %c0_i32 : i32, i32
  }
  func.func @transform_1(%arg0: i32, %arg1: memref<1xf32, #tpu.memory_space<smem>>) -> (i32, i32) {
    %c0_i32 = arith.constant 0 : i32
    %c0_i32_0 = arith.constant 0 : i32
    return %arg0, %c0_i32 : i32, i32
  }
}

</mosaic_0001>

<bundles_post_ra>
// kernel: tpu_custom_call.1
= control target key start
LH: loop header
LB: loop body
LE: loop exit
PB: predicated region body
PF: predicated region fallthrough
CT: control target
= control target key end

     0   :  { %s567_s0 = inlined_call_operand.<no memory space> [shape: f32[1], index: 0, kind: input, shape index: {}]   ;;  %s568_s1 = inlined_call_operand.hbm [shape: f32[16,128], index: 1, kind: input, shape index: {}]   ;;  %s569_s2 = inlined_call_operand.hbm [shape: f32[16,128], index: 2, kind: output, shape index: {}]  }
   0x1   :  { %7 = sst [smem:[#allocation3]] %s567_s0 }
   0x2   :  { %8 = vsyncpa [#allocation5], 0 }
   0x3   :  { %10 = vsyncpa [#allocation5 + $0x1], 0 }
   0x4   :  { %11 = vsyncpa [#allocation6], 0 }
   0x5   :  { %13 = vsyncpa [#allocation6 + $0x1], 0  ;;  %s406_s11 = smov 0   ;;  %s408_s12 = smov 0  }
   0x6   :  { %s410_s13 = smov 0   ;;  %s412_s14 = smov 0  }
   0x7 LB: > { %s427_s0 = sadd.s32 4294967295, %s384_s14   ;;  %s228_s15 = sadd.s32 4294967294, %s384_s14   ;;  %s384_s14 = sphi %s412_s14, %s584_s14   ;;  %s380_s13 = sphi %s410_s13, %s583_s13   ;;  %s376_s12 = sphi %s408_s12, %s582_s12   ;;  %s372_s11 = sphi %s406_s11, %s581_s11  }
   0x8   : > { %s431_s16 = sadd.s32 1, %s384_s14   ;;  %s26_s17 = sadd.s32 1, %s380_s13 }
   0x9   : > { %s23_s18 = ssub.s32 %s384_s14, %s431_s16  ;;  %p33_p0 = scmp.ne.s32.totalorder %s380_s13, %s376_s12 }
   0xa   : > { %p24_p1 = scmp.eq.s32.totalorder %s23_s18, 0  ;;  %p34_p2 = scmp.eq.s32.totalorder %s384_s14, 0 }
   0xb   : > { %p39_p3 = scmp.ne.s32.totalorder %s376_s12, %s372_s11  ;;  %p40_p4 = scmp.eq.s32.totalorder %s427_s0, 0 }
   0xc   : > { %s443_s19 = scalar_select %p24_p1, %s380_s13, %s26_s17  }
   0xd   : > { %p445_p5 = por %p34_p2, %p33_p0  ;;  %p449_p6 = por %p40_p4, %p39_p3 }
   0xe   : > { %p63_p7 = scmp.eq.s32.totalorder %s427_s0, 1  ;;  %p69_p8 = scmp.eq.s32.totalorder %s228_s15, 1 }
   0xf   : > { %p252_p10 = scmp.lt.s32.totalorder %s384_s14, 2  ;;  %s89_s24 = sand.u32 1, %s380_s13  }
  0x10   : > { %p456_p11 = por %p63_p7, %p33_p0  ;;  %p460_p12 = por %p69_p8, %p39_p3 }
  0x11   : > { %s232_s25 = sshll.u32 %s384_s14, 7  ;;  %s231_s26 = sshll.u32 %s89_s24, 3 }
  0x12   : > { %s573_s22 = scalar_select %p456_p11, 1, 0 }
  0x13   : > { %s574_s23 = scalar_select %p460_p12, 1, 0 }
  0x14   : > { %s469_s29 = scalar_lea.hbm %s568_s1, %s232_s25  ;;  %s93_s30 = scalar_lea.vmem [#allocation4], %s231_s26 }
  0x15   : > { %s100_s3 = sshll.u32 %s93_s30, 4  ;;  %p473_p13 = pnand %p252_p10, %p445_p5  ;;  %s477_s3 = int_to_ptr.vmem [resolvable:$true] %s100_s3 }
  0x16   : > { %s90_s5 = scalar_lea.sflag [#allocation5], %s89_s24  ;;  %s288_s6 = scalar_lea.hbm %s469_s29, 128 }
  0x17   : > { %p289_p2 = scmp.ne.s32.totalorder %s469_s29, %s288_s6  ;;  %p290_p3 = pneg %p473_p13 }
  0x18   : > { %s293_s9 = scalar_lea.hbm %s568_s1, 256  ;;  %p294_p5 = scmp.lt.u32.totalorder %s469_s29, %s568_s1 }
  0x19   : > { %p291_p4 = pnand %p290_p3, %p289_p2  ;;  %p295_p8 = scmp.lt.u32.totalorder %s293_s9, %s288_s6 }
  0x1a   : > { %p297_p9 = scmp.lt.u32.totalorder %s288_s6, %s469_s29 }
  0x1b   : > { %p292_p7 = pneg %p291_p4  ;;  %p296_p10 = por %p295_p8, %p294_p5 }
  0x1d   : > { %p298_p0 = por %p297_p9, %p296_p10 }
  0x1f   : > { %p299_p1 = pnand %p298_p0, %p292_p7 }
  0x21   : > { %302 = shalt.err (!%p299_p1)
}
  0x22   : > { %s303_s17 = scalar_lea.vmem %s477_s3, 128  ;;  %s386_s18 = smov [#allocation4]  }
  0x23   : > { %p304_p2 = scmp.ne.s32.totalorder %s477_s3, %s303_s17  ;;  %s308_s20 = sshll.u32 %s386_s18, 4  ;;  %s309_s20 = int_to_ptr.vmem [resolvable:$false] %s308_s20 }
  0x24   : > { %s310_s24 = scalar_lea.vmem %s309_s20, 256  ;;  %p311_p11 = scmp.lt.s32.totalorder %s477_s3, %s309_s20 }
  0x25   : > { %p306_p4 = pnand %p304_p2, %p290_p3  ;;  %p312_p5 = scmp.lt.s32.totalorder %s310_s24, %s303_s17 }
  0x27   : > { %p307_p12 = pneg %p306_p4  ;;  %p313_p8 = por %p312_p5, %p311_p11 }
  0x29   : > { %p314_p9 = pnand %p313_p8, %p307_p12 }
  0x2b   : > { %317 = shalt.err (!%p314_p9)
}
  0x2c   : > { %247 = dma.hbm_to_vmem [thread:$0]  (!%p473_p13), %s469_s29, 128, %s477_s3, %s90_s5  }
  0x2d   : > { %p576_p0 = scmp.lt.s32.totalorder %s384_s14, 3  ;;  %p577_p1 = scmp.ge.s32.totalorder %s384_s14, 1 }
  0x2f   : > { %p106_p3 = pnand %p577_p1, %p576_p0 }
  0x30   : > { %s511_s25 = sand.u32 (!%p106_p3), 1, %s376_s12  }
  0x31   : > { %109 = sbr.rel (%p106_p3) target bundleno = 99 (0x63), region = 24  ;;  %s234_s26 = sshll.u32 (!%p106_p3), %s511_s25, 3 }
  0x32   : > { %s112_s27 = scalar_lea.sflag (!%p106_p3), [#allocation5], %s511_s25  ;;  %s115_s28 = scalar_lea.vmem (!%p106_p3), [#allocation4], %s234_s26 }
  0x38   : > { %363 = dma.done.wait (%p449_p6), %s112_s27, 128  }
  0x39   : > { %365 = vsyncadd (%p449_p6), %s112_s27, 4294967168  ;;  %s134_s29 = sld [smem:[#allocation3]]  ;;  %v135_v1 = vld [vmem:[%s115_s28] sm:$0xff]  ;;  %s133_s30 = scalar_lea.vmem [#allocation7], %s234_s26 }
  0x3a   : > { %s158_s3 = sshll.u32 %s133_s30, 4  ;;  %s237_s4 = sshll.u32 %s427_s0, 7  ;;  %s520_s3 = int_to_ptr.vmem [resolvable:$true] %s158_s3 }
  0x3b   : > { %s525_s6 = scalar_lea.hbm %s569_s2, %s237_s4  ;;  %s145_s7 = scalar_lea.sflag [#allocation6], %s511_s25 }
  0x3c   : > { %s318_s8 = scalar_lea.vmem %s520_s3, 128  ;;  %p578_p11 = scmp.ne.s32.totalorder %s573_s22, 0 }
  0x3d   : > { %p319_p6 = scmp.ne.s32.totalorder %s520_s3, %s318_s8  ;;  %s387_s0 = smov [#allocation7]  }
  0x3e   : > { %s322_s9 = sshll.u32 %s387_s0, 4  ;;  %s323_s9 = int_to_ptr.vmem [resolvable:$false] %s322_s9 }
  0x3f   : > { %v136_v0 = vstv %s134_s29  ;;  %p320_p12 = pnand %p319_p6, %p578_p11  ;;  %s324_s10 = scalar_lea.vmem %s323_s9, 256 }
  0x40   : > { %v137_v2 = vmul.f32 %v136_v0, %v135_v1  ;;  %p325_p7 = scmp.lt.s32.totalorder %s520_s3, %s323_s9  ;;  %p326_p10 = scmp.lt.s32.totalorder %s324_s10, %s318_s8 }
  0x41   : > { %p321_p13 = pneg %p320_p12 }
  0x42   : > { %v138_v3 = vmul.f32 0.5, %v137_v2  ;;  %p327_p2 = por %p326_p10, %p325_p7 }
  0x44   : > { %286 = vtanh.f32 %v138_v3  ;;  %p328_p4 = pnand %p327_p2, %p321_p13 }
  0x4e   : > { %v287_v4 = vpop.eup %286 }
  0x4f   : > { %v140_v5 = vmul.f32 0.5, %v287_v4 }
  0x51   : > { %v141_v6 = vadd.f32 0.5, %v140_v5 }
  0x53   : > { %v142_v7 = vmul.f32 %v141_v6, %v135_v1 }
  0x55   : > { %143 = vst [vmem:[%s133_s30] sm:$0xff] %v142_v7 }
  0x56   : > { %331 = shalt.err (!%p328_p4)
}
  0x57   : > { %s332_s15 = scalar_lea.hbm %s525_s6, 128  ;;  %s336_s20 = scalar_lea.hbm %s569_s2, 256 }
  0x58   : > { %p333_p5 = scmp.ne.s32.totalorder %s525_s6, %s332_s15  ;;  %p337_p0 = scmp.lt.u32.totalorder %s525_s6, %s569_s2 }
  0x59   : > { %p338_p1 = scmp.lt.u32.totalorder %s336_s20, %s332_s15  ;;  %p340_p6 = scmp.lt.u32.totalorder %s332_s15, %s525_s6 }
  0x5a   : > { %p334_p8 = pnand %p333_p5, %p578_p11 }
  0x5b   : > { %p339_p3 = por %p338_p1, %p337_p0 }
  0x5c   : > { %p335_p9 = pneg %p334_p8 }
  0x5d   : > { %p341_p12 = por %p340_p6, %p339_p3 }
  0x5f   : > { %p342_p13 = pnand %p341_p12, %p335_p9 }
  0x61   : > { %345 = shalt.err (!%p342_p13)
}
  0x62   : > { %242 = dma.vmem_to_hbm [thread:$0]  (%p578_p11), %s520_s3, 128, %s525_s6, %s145_s7  }
  0x63 PF: > { %s170_s26 = sand.u32 1, %s372_s11   ;;  %p579_p7 = scmp.ne.s32.totalorder %s574_s23, 0 }
  0x64   : > { %p580_p10 = scmp.ge.s32.totalorder %s384_s14, 2  ;;  %s171_s27 = scalar_lea.sflag [#allocation6], %s170_s26 }
  0x66   : > { %p249_p2 = pnand %p580_p10, %p579_p7 }
  0x68   : > { %367 = dma.done.wait (!%p249_p2), %s171_s27, 128  }
  0x69   : > { %369 = vsyncadd (!%p249_p2), %s171_s27, 4294967168  ;;  %p16_p4 = scmp.ge.s32.totalorder %s431_s16, 4   ;;  %s581_s11 = smov %s376_s12 }
  0x6a   : > { %s582_s12 = smov %s380_s13  ;;  %s583_s13 = smov %s443_s19 }
  0x6b   : > { %s584_s14 = smov %s431_s16  ;;  %18 = sbr.rel (!%p16_p4) target bundleno = 7 (0x7), region = 69 }
  0x72   :  { %176 = vsyncpa [#allocation5], 1 }
  0x73   :  { %178 = vsyncpa [#allocation5 + $0x1], 1 }
  0x74   :  { %179 = vsyncpa [#allocation6], 1 }
  0x75   :  { %181 = vsyncpa [#allocation6 + $0x1], 1 }

</bundles_post_ra>
